<compile_context>
chip_gen: v7x
topology: tpu7x:2x2x1
jax: 0.10.0
libtpu: 0.0.40
codegen_flags: <defaults>
</compile_context>

<pallas_src>
import numpy as np
import jax
import jax.numpy as jnp
from jax import lax
from jax.experimental import pallas as pl
from jax.experimental.pallas import tpu as pltpu


# ---------------------------------------------------------------------------
# Fused Pallas kernel: conv1 + conv2 + spatial softmax + Q1/Q2 MLPs
# ---------------------------------------------------------------------------

def _critic_fused_kernel(p_ref, w1_ref, b1_ref, w2_ref, b2_ref, red_ref,
                         pa_ref, wq1_ref, bq1_ref, wq2_ref, bq2_ref,
                         wq3_ref, bq3_ref, o_ref):
    f32 = jnp.float32
    batch = pa_ref.shape[0]

    # --- conv1 (+ReLU): ONE aligned dot against the block-diagonal conv1
    # weight; output columns already t-major (t = kh2*K + kw2), i.e. exactly
    # the row order of w2m, so conv2 below is a single plain dot. -------------
    h1 = jnp.dot(p_ref[...], w1_ref[...], preferred_element_type=f32)
    h1 = jnp.maximum(h1 + b1_ref[...], 0.0)                    # (B*S2, KK*C1)

    # --- conv2: ONE dot, bias added after the contraction --------------------
    h2 = jnp.dot(h1, w2_ref[...], preferred_element_type=f32) + b2_ref[...]

    # --- spatial softmax, fully batched --------------------------------------
    # A per-channel max over ALL rows is uniform within each (batch, channel)
    # group, so it cancels in the softmax exactly like a per-batch max.
    m = jnp.max(h2, axis=0, keepdims=True)                     # (1, C2)
    e = jnp.exp(h2 - m)                                        # (B*S2, C2)
    # All three per-batch reductions (sum e, sum pos_x*e, sum pos_y*e) with a
    # single MXU dot against the precomputed block reduction matrix.
    red = jnp.dot(red_ref[...], e, preferred_element_type=f32)  # (3B, C2)
    inv = pl.reciprocal(red[0:batch, :], approx=True)           # EUP slot
    ex = red[batch:2 * batch, :] * inv                          # (B, C2)
    ey = red[2 * batch:3 * batch, :] * inv                      # (B, C2)

    # --- latent assembly: a single lane concat -------------------------------
    # Kernel-friendly [ex.. | ey.. | prop | act] ordering; the Q w1 rows were
    # permuted at pack time to match PyTorch's interleaved keypoint layout.
    lat = jnp.concatenate([ex, ey, pa_ref[...]], axis=1)        # (B, d_in)

    # --- fused Q1/Q2 trunk (block-diagonal weights, (B, 2) output) -----------
    h = jnp.maximum(jnp.dot(lat, wq1_ref[...], preferred_element_type=f32)
                    + bq1_ref[...], 0.0)
    h = jnp.maximum(jnp.dot(h, wq2_ref[...], preferred_element_type=f32)
                    + bq2_ref[...], 0.0)
    q = jnp.dot(h, wq3_ref[...], preferred_element_type=f32) + bq3_ref[...]
    o_ref[...] = q.astype(o_ref.dtype)                          # col0=q1, col1=q2


# ---------------------------------------------------------------------------
# One-time parameter packing (hoisted out of the per-call hot path)
# ---------------------------------------------------------------------------

def _conv_w_to_mat(w):
    """(Cout, Cin, K, K) -> (K*K*Cin, Cout); row order (kh, kw, ci)."""
    cout = w.shape[0]
    return jnp.transpose(w, (2, 3, 1, 0)).reshape(-1, cout)


def _pack_q_params(q1, q2, n_keypoints):
    """Fuse the two Q MLPs: shared input layer, block-diagonal layers 2/3.

    The kernel builds the latent as [ex_0..ex_{C-1}, ey_0..ey_{C-1}, prop, act]
    while the PyTorch module interleaves [ex_0, ey_0, ex_1, ey_1, ...]; the
    permutation is absorbed into the w1 rows here (done once at pack time).
    """
    hid = q1['w2'].shape[0]
    d_in = q1['w1'].shape[0]
    perm = np.concatenate([np.arange(0, 2 * n_keypoints, 2),
                           np.arange(1, 2 * n_keypoints, 2),
                           np.arange(2 * n_keypoints, d_in)])
    wq1 = jnp.concatenate([q1['w1'][perm, :], q2['w1'][perm, :]], axis=1)
    bq1 = jnp.concatenate([q1['b1'], q2['b1']], axis=1)
    z = jnp.zeros((hid, hid), jnp.float32)
    wq2 = jnp.concatenate([jnp.concatenate([q1['w2'], z], axis=1),
                           jnp.concatenate([z, q2['w2']], axis=1)], axis=0)
    bq2 = jnp.concatenate([q1['b2'], q2['b2']], axis=1)
    z1 = jnp.zeros((hid, 1), jnp.float32)
    wq3 = jnp.concatenate([jnp.concatenate([q1['w3'], z1], axis=1),
                           jnp.concatenate([z1, q2['w3']], axis=1)], axis=0)
    bq3 = jnp.concatenate([q1['b3'], q2['b3']], axis=1)
    return wq1, bq1, wq2, bq2, wq3, bq3


def pack_critic_params(params, batch, image_shape, conv_k=3, conv_stride=2):
    """Pack all weight tensors once (call only when params / batch change)."""
    _, H, W = image_shape
    C1 = params['conv1_b'].shape[0]
    C2 = params['conv2_b'].shape[0]
    K, KK = conv_k, conv_k * conv_k
    f32 = jnp.float32

    def cos(n):
        return (n - K) // conv_stride + 1

    OH2, OW2 = cos(cos(H)), cos(cos(W))
    S2 = OH2 * OW2

    # /255 normalization folded into the conv1 weight matrix (bias untouched).
    w1m = _conv_w_to_mat(params['conv1_w']).astype(f32) * jnp.float32(1.0 / 255.0)
    # Block-diagonal conv1 weight: conv1 over the doubly-expanded patch matrix
    # is one dot whose columns come out t-major, so conv2 is one more dot.
    w1_bd = jnp.kron(jnp.eye(KK, dtype=f32), w1m)              # (KK*KK*Cin, KK*C1)
    b1t = jnp.tile(params['conv1_b'].reshape(1, C1).astype(f32), (1, KK))
    w2m = _conv_w_to_mat(params['conv2_w']).astype(f32)        # (KK*C1, C2)
    b2 = params['conv2_b'].reshape(1, C2).astype(f32)

    # Block reduction matrix for the batched spatial softmax:
    # rows [ones_b.. | pos_x_b.. | pos_y_b..] with per-batch column blocks.
    eyeB = jnp.eye(batch, dtype=f32)
    ones_row = jnp.ones((1, S2), f32)
    px = params['pos_x'].reshape(1, S2).astype(f32)
    py = params['pos_y'].reshape(1, S2).astype(f32)
    red = jnp.concatenate([jnp.kron(eyeB, ones_row),
                           jnp.kron(eyeB, px),
                           jnp.kron(eyeB, py)], axis=0)        # (3B, B*S2)

    wq1, bq1, wq2, bq2, wq3, bq3 = _pack_q_params(params['q1'], params['q2'], C2)
    return {'w1_bd': w1_bd, 'b1t': b1t, 'w2m': w2m, 'b2': b2, 'red': red,
            'wq1': wq1, 'bq1': bq1, 'wq2': wq2, 'bq2': bq2,
            'wq3': wq3, 'bq3': bq3}


# ---------------------------------------------------------------------------
# Per-call glue: image-dependent im2col only, then the fused pallas_call
# ---------------------------------------------------------------------------

def _im2col_nhwc(x, k, s):
    """(B,H,W,C) -> (B,OH,OW,k*k,C) patches, patch index ordered (kh,kw)."""
    B, H, W, C = x.shape
    OH = (H - k) // s + 1
    OW = (W - k) // s + 1
    cols = [x[:, kh:kh + OH * s:s, kw:kw + OW * s:s, :]
            for kh in range(k) for kw in range(k)]
    return jnp.stack(cols, axis=3), OH, OW


def make_critic_forward(conv_k=3, conv_stride=2):
    @jax.jit
    def critic_forward(packed, images, proprioceptions, actions):
        """Pallas implementation of CriticModel.forward -> (q1s, q2s)."""
        x = images.astype(jnp.float32)
        # rad_offset == 0 -> random_augment / center-crop is an identity.
        x = jnp.transpose(x, (0, 2, 3, 1))                     # NHWC
        B = x.shape[0]

        # Double im2col: rows ordered (b, oh2, ow2); columns ordered
        # (t = kh2*K+kw2, kh1, kw1, ci) so conv1/conv2 are two aligned dots.
        p1_5d, OH1, OW1 = _im2col_nhwc(x, conv_k, conv_stride)
        p1 = p1_5d.reshape(B, OH1, OW1, -1)
        p2_5d, OH2, OW2 = _im2col_nhwc(p1, conv_k, conv_stride)
        S2 = OH2 * OW2
        p = p2_5d.reshape(B * S2, -1)                          # (B*S2, KK*KK*Cin)

        pa = jnp.concatenate([proprioceptions.astype(jnp.float32),
                              actions.astype(jnp.float32)], axis=1)

        # Advisory cost hint for XLA scheduling of the surrounding glue.
        c1kk = packed['w1_bd'].shape[1]
        c2 = packed['w2m'].shape[1]
        d_in = packed['wq1'].shape[0]
        hid2 = packed['wq1'].shape[1]
        m_rows = B * S2
        flops = int(2 * (m_rows * p.shape[1] * c1kk
                         + m_rows * c1kk * c2
                         + packed['red'].shape[0] * m_rows * c2
                         + B * (d_in * hid2 + hid2 * hid2 + hid2 * 2)))
        transcendentals = int(m_rows * c2 + B * c2)
        bytes_accessed = int(4 * (p.size + pa.size + B * 2
                                  + sum(v.size for v in packed.values())))

        out = pl.pallas_call(
            _critic_fused_kernel,
            out_shape=jax.ShapeDtypeStruct((B, 2), jnp.float32),
            in_specs=[pl.BlockSpec(memory_space=pltpu.MemorySpace.VMEM)] * 13,
            out_specs=pl.BlockSpec(memory_space=pltpu.MemorySpace.VMEM),
            cost_estimate=pl.CostEstimate(flops=flops,
                                          transcendentals=transcendentals,
                                          bytes_accessed=bytes_accessed),
        )(p, packed['w1_bd'], packed['b1t'], packed['w2m'], packed['b2'],
          packed['red'], pa,
          packed['wq1'], packed['bq1'], packed['wq2'], packed['bq2'],
          packed['wq3'], packed['bq3'])

        return out[:, 0:1], out[:, 1:2]

    return critic_forward


# ---------------------------------------------------------------------------
# Pure-JAX reference mirroring the PyTorch ops (for correctness check)
# ---------------------------------------------------------------------------

def critic_forward_ref(params, images, proprio, actions):
    x = images.astype(jnp.float32) / 255.0

    def conv(x, w, b, s):
        y = lax.conv_general_dilated(
            x, w, (s, s), 'VALID', dimension_numbers=('NCHW', 'OIHW', 'NCHW'))
        return y + b[None, :, None, None]

    x = jnp.maximum(conv(x, params['conv1_w'], params['conv1_b'], 2), 0.0)
    x = conv(x, params['conv2_w'], params['conv2_b'], 2)
    B, C, Hf, Wf = x.shape
    f = x.reshape(B * C, Hf * Wf)
    p = jax.nn.softmax(f, axis=-1)
    ex = jnp.sum(params['pos_x'][None, :] * p, axis=1, keepdims=True)
    ey = jnp.sum(params['pos_y'][None, :] * p, axis=1, keepdims=True)
    h = jnp.concatenate([ex, ey], axis=1).reshape(B, C * 2)
    latents = jnp.concatenate([h, proprio], axis=-1)

    def q(qp):
        z = jnp.concatenate([latents, actions], axis=1)
        z = jnp.maximum(z @ qp['w1'] + qp['b1'], 0.0)
        z = jnp.maximum(z @ qp['w2'] + qp['b2'], 0.0)
        return z @ qp['w3'] + qp['b3']

    return q(params['q1']), q(params['q2'])


# ---------------------------------------------------------------------------
# Main: deterministic synthetic params + inputs
# ---------------------------------------------------------------------------

if __name__ == "__main__":
    key = jax.random.PRNGKey(0)

    # Small shapes consistent with the module.
    B = 2
    C_in, H, W = 4, 16, 16          # image_shape = (4, 16, 16)
    proprio_dim = 6                 # proprioception_shape = (6,)
    action_dim = 4
    hidden = 32                     # net_params['mlp'] = [[*,32],[32,32],[32,1]]
    C1, C2 = 8, 8                   # net_params['conv'] = [[4,8,3,2],[8,8,3,2]]
    rad_offset = 0.0                # -> rad_h = rad_w = 0 (identity crop)

    def cos(n, k, s):               # conv_out_size
        return (n - k) // s + 1

    H1, W1 = cos(H, 3, 2), cos(W, 3, 2)     # 7, 7
    H2, W2 = cos(H1, 3, 2), cos(W1, 3, 2)   # 3, 3
    latent_dim = C2 * 2 + proprio_dim       # spatial softmax keypoints + proprio
    d_in = latent_dim + action_dim

    keys = jax.random.split(key, 20)

    def rnd(k, shape, scale=0.1):
        # Synthetic deterministic init (stands in for orthogonal/zero init).
        return (scale * jax.random.normal(k, shape)).astype(jnp.float32)

    params = {
        'conv1_w': rnd(keys[0], (C1, C_in, 3, 3)),
        'conv1_b': rnd(keys[1], (C1,)),
        'conv2_w': rnd(keys[2], (C2, C1, 3, 3)),
        'conv2_b': rnd(keys[3], (C2,)),
    }

    # SpatialSoftmax position buffers, exactly as the PyTorch module builds
    # them: SpatialSoftmax(width, height, C) -> self.height=W2, self.width=H2.
    ss_h, ss_w = W2, H2
    px, py = np.meshgrid(np.linspace(-1.0, 1.0, ss_h),
                         np.linspace(-1.0, 1.0, ss_w))
    params['pos_x'] = jnp.asarray(px.reshape(ss_h * ss_w), jnp.float32)
    params['pos_y'] = jnp.asarray(py.reshape(ss_h * ss_w), jnp.float32)

    def q_params(ks):
        return {'w1': rnd(ks[0], (d_in, hidden)),   'b1': rnd(ks[1], (1, hidden)),
                'w2': rnd(ks[2], (hidden, hidden)), 'b2': rnd(ks[3], (1, hidden)),
                'w3': rnd(ks[4], (hidden, 1)),      'b3': rnd(ks[5], (1, 1))}

    params['q1'] = q_params(keys[4:10])
    params['q2'] = q_params(keys[10:16])

    images = jax.random.uniform(keys[16], (B, C_in, H, W),
                                minval=0.0, maxval=255.0, dtype=jnp.float32)
    proprio = jax.random.normal(keys[17], (B, proprio_dim), dtype=jnp.float32)
    actions = jax.random.normal(keys[18], (B, action_dim), dtype=jnp.float32)

    # One-time packing (hoisted out of the per-call path), then the jitted
    # forward. Profile the WHOLE jit in xprof, not just the pallas_call.
    packed = jax.block_until_ready(
        pack_critic_params(params, B, (C_in, H, W), conv_k=3, conv_stride=2))
    critic_forward = make_critic_forward(conv_k=3, conv_stride=2)

    q1, q2 = jax.block_until_ready(
        critic_forward(packed, images, proprio, actions))

    r1, r2 = critic_forward_ref(params, images, proprio, actions)
    np.testing.assert_allclose(np.asarray(q1), np.asarray(r1), atol=1e-3, rtol=1e-3)
    np.testing.assert_allclose(np.asarray(q2), np.asarray(r2), atol=1e-3, rtol=1e-3)
    assert q1.shape == (B, 1) and q2.shape == (B, 1)

    print("KERNEL_OK")
</pallas_src>

<mosaic_0001>
module attributes {stable_mosaic.version = 11 : i64} {
  func.func @_critic_fused_kernel(%arg0: memref<18x324xf32, #tpu.memory_space<vmem>>, %arg1: memref<324x72xf32, #tpu.memory_space<vmem>>, %arg2: memref<1x72xf32, #tpu.memory_space<vmem>>, %arg3: memref<72x8xf32, #tpu.memory_space<vmem>>, %arg4: memref<1x8xf32, #tpu.memory_space<vmem>>, %arg5: memref<6x18xf32, #tpu.memory_space<vmem>>, %arg6: memref<2x10xf32, #tpu.memory_space<vmem>>, %arg7: memref<26x64xf32, #tpu.memory_space<vmem>>, %arg8: memref<1x64xf32, #tpu.memory_space<vmem>>, %arg9: memref<64x64xf32, #tpu.memory_space<vmem>>, %arg10: memref<1x64xf32, #tpu.memory_space<vmem>>, %arg11: memref<64x2xf32, #tpu.memory_space<vmem>>, %arg12: memref<1x2xf32, #tpu.memory_space<vmem>>, %arg13: memref<2x2xf32, #tpu.memory_space<vmem>>) attributes {dimension_semantics = [], scalar_prefetch = 0 : i64, scratch_operands = 0 : i64, tpu.core_type = #tpu.core_type<tc>} {
    %c0 = arith.constant 0 : index
    %c0_0 = arith.constant 0 : index
    %0 = vector.load %arg0[%c0, %c0_0] : memref<18x324xf32, #tpu.memory_space<vmem>>, vector<18x324xf32>
    %c0_1 = arith.constant 0 : index
    %c0_2 = arith.constant 0 : index
    %1 = vector.load %arg1[%c0_1, %c0_2] : memref<324x72xf32, #tpu.memory_space<vmem>>, vector<324x72xf32>
    %cst = arith.constant dense<0.000000e+00> : vector<18x72xf32>
    %2 = tpu.matmul %0, %1, %cst {dimension_numbers = #tpu.dot_dimension_numbers<[1], [0], [0], [1], [0, 0, 1, 1], [], []>} : vector<18x324xf32>, vector<324x72xf32>, vector<18x72xf32> -> vector<18x72xf32>
    %c0_3 = arith.constant 0 : index
    %c0_4 = arith.constant 0 : index
    %3 = vector.load %arg2[%c0_3, %c0_4] : memref<1x72xf32, #tpu.memory_space<vmem>>, vector<1x72xf32>
    %4 = vector.broadcast %3 : vector<1x72xf32> to vector<18x72xf32>
    %5 = arith.addf %2, %4 : vector<18x72xf32>
    %cst_5 = arith.constant 0.000000e+00 : f32
    %6 = vector.broadcast %cst_5 : f32 to vector<18x72xf32>
    %7 = arith.maximumf %5, %6 : vector<18x72xf32>
    %c0_6 = arith.constant 0 : index
    %c0_7 = arith.constant 0 : index
    %8 = vector.load %arg3[%c0_6, %c0_7] : memref<72x8xf32, #tpu.memory_space<vmem>>, vector<72x8xf32>
    %cst_8 = arith.constant dense<0.000000e+00> : vector<18x8xf32>
    %9 = tpu.matmul %7, %8, %cst_8 {dimension_numbers = #tpu.dot_dimension_numbers<[1], [0], [0], [1], [0, 0, 1, 1], [], []>} : vector<18x72xf32>, vector<72x8xf32>, vector<18x8xf32> -> vector<18x8xf32>
    %c0_9 = arith.constant 0 : index
    %c0_10 = arith.constant 0 : index
    %10 = vector.load %arg4[%c0_9, %c0_10] : memref<1x8xf32, #tpu.memory_space<vmem>>, vector<1x8xf32>
    %11 = vector.broadcast %10 : vector<1x8xf32> to vector<18x8xf32>
    %12 = arith.addf %9, %11 : vector<18x8xf32>
    %cst_11 = arith.constant dense<0xFF800000> : vector<8xf32>
    %13 = vector.multi_reduction <maximumf>, %12, %cst_11 [0] : vector<18x8xf32> to vector<8xf32>
    %14 = vector.shape_cast %13 : vector<8xf32> to vector<1x8xf32>
    %15 = vector.broadcast %14 : vector<1x8xf32> to vector<18x8xf32>
    %16 = arith.subf %12, %15 : vector<18x8xf32>
    %17 = math.exp %16 : vector<18x8xf32>
    %c0_12 = arith.constant 0 : index
    %c0_13 = arith.constant 0 : index
    %18 = vector.load %arg5[%c0_12, %c0_13] : memref<6x18xf32, #tpu.memory_space<vmem>>, vector<6x18xf32>
    %cst_14 = arith.constant dense<0.000000e+00> : vector<6x8xf32>
    %19 = tpu.matmul %18, %17, %cst_14 {dimension_numbers = #tpu.dot_dimension_numbers<[1], [0], [0], [1], [0, 0, 1, 1], [], []>} : vector<6x18xf32>, vector<18x8xf32>, vector<6x8xf32> -> vector<6x8xf32>
    %20 = vector.extract_strided_slice %19 {offsets = [0, 0], sizes = [2, 8], strides = [1, 1]} : vector<6x8xf32> to vector<2x8xf32>
    %21 = tpu.reciprocal %20 {approx = true} : vector<2x8xf32> -> vector<2x8xf32>
    %22 = vector.extract_strided_slice %19 {offsets = [2, 0], sizes = [2, 8], strides = [1, 1]} : vector<6x8xf32> to vector<2x8xf32>
    %23 = arith.mulf %22, %21 : vector<2x8xf32>
    %24 = vector.extract_strided_slice %19 {offsets = [4, 0], sizes = [2, 8], strides = [1, 1]} : vector<6x8xf32> to vector<2x8xf32>
    %25 = arith.mulf %24, %21 : vector<2x8xf32>
    %c0_15 = arith.constant 0 : index
    %c0_16 = arith.constant 0 : index
    %26 = vector.load %arg6[%c0_15, %c0_16] : memref<2x10xf32, #tpu.memory_space<vmem>>, vector<2x10xf32>
    %27 = tpu.concatenate %23, %25, %26 in 1 : vector<2x8xf32>, vector<2x8xf32>, vector<2x10xf32> -> vector<2x26xf32>
    %c0_17 = arith.constant 0 : index
    %c0_18 = arith.constant 0 : index
    %28 = vector.load %arg7[%c0_17, %c0_18] : memref<26x64xf32, #tpu.memory_space<vmem>>, vector<26x64xf32>
    %cst_19 = arith.constant dense<0.000000e+00> : vector<2x64xf32>
    %29 = tpu.matmul %27, %28, %cst_19 {dimension_numbers = #tpu.dot_dimension_numbers<[1], [0], [0], [1], [0, 0, 1, 1], [], []>} : vector<2x26xf32>, vector<26x64xf32>, vector<2x64xf32> -> vector<2x64xf32>
    %c0_20 = arith.constant 0 : index
    %c0_21 = arith.constant 0 : index
    %30 = vector.load %arg8[%c0_20, %c0_21] : memref<1x64xf32, #tpu.memory_space<vmem>>, vector<1x64xf32>
    %31 = vector.broadcast %30 : vector<1x64xf32> to vector<2x64xf32>
    %32 = arith.addf %29, %31 : vector<2x64xf32>
    %cst_22 = arith.constant 0.000000e+00 : f32
    %33 = vector.broadcast %cst_22 : f32 to vector<2x64xf32>
    %34 = arith.maximumf %32, %33 : vector<2x64xf32>
    %c0_23 = arith.constant 0 : index
    %c0_24 = arith.constant 0 : index
    %35 = vector.load %arg9[%c0_23, %c0_24] : memref<64x64xf32, #tpu.memory_space<vmem>>, vector<64x64xf32>
    %cst_25 = arith.constant dense<0.000000e+00> : vector<2x64xf32>
    %36 = tpu.matmul %34, %35, %cst_25 {dimension_numbers = #tpu.dot_dimension_numbers<[1], [0], [0], [1], [0, 0, 1, 1], [], []>} : vector<2x64xf32>, vector<64x64xf32>, vector<2x64xf32> -> vector<2x64xf32>
    %c0_26 = arith.constant 0 : index
    %c0_27 = arith.constant 0 : index
    %37 = vector.load %arg10[%c0_26, %c0_27] : memref<1x64xf32, #tpu.memory_space<vmem>>, vector<1x64xf32>
    %38 = vector.broadcast %37 : vector<1x64xf32> to vector<2x64xf32>
    %39 = arith.addf %36, %38 : vector<2x64xf32>
    %cst_28 = arith.constant 0.000000e+00 : f32
    %40 = vector.broadcast %cst_28 : f32 to vector<2x64xf32>
    %41 = arith.maximumf %39, %40 : vector<2x64xf32>
    %c0_29 = arith.constant 0 : index
    %c0_30 = arith.constant 0 : index
    %42 = vector.load %arg11[%c0_29, %c0_30] : memref<64x2xf32, #tpu.memory_space<vmem>>, vector<64x2xf32>
    %cst_31 = arith.constant dense<0.000000e+00> : vector<2x2xf32>
    %43 = tpu.matmul %41, %42, %cst_31 {dimension_numbers = #tpu.dot_dimension_numbers<[1], [0], [0], [1], [0, 0, 1, 1], [], []>} : vector<2x64xf32>, vector<64x2xf32>, vector<2x2xf32> -> vector<2x2xf32>
    %c0_32 = arith.constant 0 : index
    %c0_33 = arith.constant 0 : index
    %44 = vector.load %arg12[%c0_32, %c0_33] : memref<1x2xf32, #tpu.memory_space<vmem>>, vector<1x2xf32>
    %45 = vector.broadcast %44 : vector<1x2xf32> to vector<2x2xf32>
    %46 = arith.addf %43, %45 : vector<2x2xf32>
    %c0_34 = arith.constant 0 : index
    %c0_35 = arith.constant 0 : index
    %47 = vector.load %arg13[%c0_34, %c0_35] : memref<2x2xf32, #tpu.memory_space<vmem>>, vector<2x2xf32>
    tpu.vector_store %arg13[%c0_34, %c0_35], %46 {strides = array<i32>} : memref<2x2xf32, #tpu.memory_space<vmem>>, vector<2x2xf32>,
    return
  }
}

</mosaic_0001>

<bundles_post_ra>
// kernel: critic_forward.1
= control target key start
LH: loop header
LB: loop body
LE: loop exit
PB: predicated region body
PF: predicated region fallthrough
CT: control target
= control target key end

     0   :  { %v1107_v3 = vmov 0.0|0.0   ;;  %vm1108_vm0 = vmmov 0   ;;  %v1109_v4 = vmov 0.0   ;;  %vm111_vm1 = vcmask 1043456   ;;  %s1494_s1 = inlined_call_operand.vmem [shape: f32[324,72], index: 1, kind: input, shape index: {}]   ;;  %s1495_s0 = inlined_call_operand.vmem [shape: f32[18,324], index: 0, kind: input, shape index: {}]   ;;  %s1496_s3 = inlined_call_operand.vmem [shape: f32[72,8], index: 3, kind: input, shape index: {}]   ;;  %s1497_s2 = inlined_call_operand.vmem [shape: f32[1,72], index: 2, kind: input, shape index: {}]   ;;  %s1498_s4 = inlined_call_operand.vmem [shape: f32[1,8], index: 4, kind: input, shape index: {}]   ;;  %s1499_s5 = inlined_call_operand.vmem [shape: f32[6,18], index: 5, kind: input, shape index: {}]   ;;  %s1500_s7 = inlined_call_operand.vmem [shape: f32[26,64], index: 7, kind: input, shape index: {}]   ;;  %s1501_s6 = inlined_call_operand.vmem [shape: f32[2,10], index: 6, kind: input, shape index: {}]   ;;  %s1502_s9 = inlined_call_operand.vmem [shape: f32[64,64], index: 9, kind: input, shape index: {}]   ;;  %s1503_s11 = inlined_call_operand.vmem [shape: f32[64,2], index: 11, kind: input, shape index: {}]   ;;  %s1504_s8 = inlined_call_operand.vmem [shape: f32[1,64], index: 8, kind: input, shape index: {}]   ;;  %s1505_s10 = inlined_call_operand.vmem [shape: f32[1,64], index: 10, kind: input, shape index: {}]   ;;  %s1506_s12 = inlined_call_operand.vmem [shape: f32[1,2], index: 12, kind: input, shape index: {}]   ;;  %s1507_s13 = inlined_call_operand.vmem [shape: f32[2,2], index: 13, kind: output, shape index: {}]  }
   0x1   :  { %v69_v0 = vld [vmem:[%s1494_s1 + $0x80] sm:$0xff]  ;;  %v70_v1 = vld [vmem:[%s1494_s1 + $0x88] sm:$0xff]  ;;  %1035 = vmatprep.subr.bf16.mxu1 %v1107_v3  ;;  %909 = vmatprep.mubr.msk.f32.mxu1 %vm1108_vm0, %v1109_v4  ;;  %v71_v7 = vld [vmem:[%s1494_s1 + $0x90] sm:$0xff]  ;;  %vm101_vm2 = vcmask 556032   ;;  %vm294_vm3 = vcmask 588800   ;;  %vm384_vm4 = vcmask 64512  }
   0x2   :  { %v53_v2 = vld [vmem:[%s1494_s1] sm:$0xff]  ;;  %v1003_v5 = vpack.c.bf16 %v70_v1, %v69_v0  ;;  %v54_v6 = vld [vmem:[%s1494_s1 + $0x8] sm:$0xff]  ;;  %v72_v8 = vld [vmem:[%s1494_s1 + $0x98] sm:$0xff]  ;;  %vm387_vm5 = vcmask 58368   ;;  %vm411_vm6 = vcmask 1041408   ;;  %vm407_vm7 = vcmask 146432  }
   0x3   :  { %v1005_v9 = vpack.c.bf16 %v54_v6, %v53_v2  ;;  %v1007_v10 = vpack.c.bf16 %v72_v8, %v71_v7  ;;  %v55_v11 = vld [vmem:[%s1494_s1 + $0x10] sm:$0xff]  ;;  %v56_v12 = vld [vmem:[%s1494_s1 + $0x18] sm:$0xff]  ;;  %v73_v13 = vld [vmem:[%s1494_s1 + $0xa0] sm:$0xff]  ;;  %vm1110_vm8 = vmmov 1   ;;  %vm505_vm10 = vcmask 130048  }
   0x4   :  { %1004 = vmatprep.subr.bf16.mxu0 %v1003_v5  ;;  %v74_v14 = vld [vmem:[%s1494_s1 + $0xa8] sm:$0xff]  ;;  %v1009_v15 = vpack.c.bf16 %v56_v12, %v55_v11  ;;  %v57_v17 = vld [vmem:[%s1494_s1 + $0x20] sm:$0xff]  ;;  %v75_v19 = vld [vmem:[%s1494_s1 + $0xb0] sm:$0xff]  ;;  %vm520_vm11 = vcmask 211968   ;;  %vm612_vm12 = vcmask 523264   ;;  %vm775_vm13 = vcmask 9216  }
   0x5   :  { %1006 = vmatpush3.bf16.msra.mxu0 %v1005_v9  ;;  %v1011_v16 = vpack.c.bf16 %v74_v14, %v73_v13  ;;  %v58_v18 = vld [vmem:[%s1494_s1 + $0x28] sm:$0xff]  ;;  %v76_v20 = vld [vmem:[%s1494_s1 + $0xb8] sm:$0xff]  ;;  %v85_v21 = vld [vmem:[%s1494_s1 + $0x100] sm:$0xff] }
   0x6   :  { %1008 = vmatprep.subr.bf16.mxu0 %v1007_v10  ;;  %v86_v22 = vld [vmem:[%s1494_s1 + $0x108] sm:$0xff]  ;;  %v1013_v23 = vpack.c.bf16 %v58_v18, %v57_v17  ;;  %v87_v25 = vld [vmem:[%s1494_s1 + $0x110] sm:$0xff]  ;;  %v1015_v26 = vpack.c.bf16 %v76_v20, %v75_v19  ;;  %v60_v28 = vld [vmem:[%s1494_s1 + $0x38] sm:$0xff] }
   0x7   :  { %v1036_v24 = vpack.c.bf16 %v86_v22, %v85_v21  ;;  %v59_v27 = vld [vmem:[%s1494_s1 + $0x30] sm:$0xff]  ;;  %v88_v29 = vld [vmem:[%s1494_s1 + $0x118] sm:$0xff]  ;;  %v77_v30 = vld [vmem:[%s1494_s1 + $0xc0] sm:$0xff] }
   0x8   :  { %v78_v31 = vld [vmem:[%s1494_s1 + $0xc8] sm:$0xff]  ;;  %v1039_v32 = vpack.c.bf16 %v88_v29, %v87_v25  ;;  %v89_v33 = vld [vmem:[%s1494_s1 + $0x120] sm:$0xff]  ;;  %v1017_v35 = vpack.c.bf16 %v60_v28, %v59_v27  ;;  %v79_v40 = vld [vmem:[%s1494_s1 + $0xd0] sm:$0xff] }
   0x9   :  { %1010 = vmatpush3.bf16.msra.mxu0 %v1009_v15  ;;  %1037 = vmatpush3.bf16.msra.mxu1 %v1036_v24  ;;  %v90_v34 = vld [vmem:[%s1494_s1 + $0x128] sm:$0xff]  ;;  %v1019_v37 = vpack.c.bf16 %v78_v31, %v77_v30  ;;  %v61_v38 = vld [vmem:[%s1494_s1 + $0x40] sm:$0xff]  ;;  %v80_v41 = vld [vmem:[%s1494_s1 + $0xd8] sm:$0xff] }
   0xa   :  { %1012 = vmatprep.subr.bf16.mxu0 %v1011_v16  ;;  %1038 = vmatprep.subr.bf16.mxu1 %v1107_v3  ;;  %v45_v36 = vld [vmem:[%s1495_s0 + $0x8] sm:$0xff]  ;;  %v1042_v42 = vpack.c.bf16 %v90_v34, %v89_v33  ;;  %v91_v43 = vld [vmem:[%s1494_s1 + $0x130] sm:$0xff]  ;;  %v92_v44 = vld [vmem:[%s1494_s1 + $0x138] sm:$0xff]  ;;  %v1023_v46 = vpack.c.bf16 %v80_v41, %v79_v40 }
   0xb   :  { %v62_v39 = vld [vmem:[%s1494_s1 + $0x48] sm:$0xff]  ;;  %179 = vmatprep.mubr.f32.mxu0 %v45_v36  ;;  %v63_v47 = vld [vmem:[%s1494_s1 + $0x50] sm:$0xff]  ;;  %v64_v48 = vld [vmem:[%s1494_s1 + $0x58] sm:$0xff]  ;;  %v1045_v51 = vpack.c.bf16 %v92_v44, %v91_v43 }
   0xc   :  { %v1021_v45 = vpack.c.bf16 %v62_v39, %v61_v38  ;;  %v81_v49 = vld [vmem:[%s1494_s1 + $0xe0] sm:$0xff]  ;;  %v82_v50 = vld [vmem:[%s1494_s1 + $0xe8] sm:$0xff]  ;;  %v1025_v52 = vpack.c.bf16 %v64_v48, %v63_v47  ;;  %v83_v56 = vld [vmem:[%s1494_s1 + $0xf0] sm:$0xff] }
   0xd   :  { %1014 = vmatpush3.bf16.msra.mxu0 %v1013_v23  ;;  %1040 = vmatpush3.bf16.msra.mxu1 %v1039_v32  ;;  %v1027_v53 = vpack.c.bf16 %v82_v50, %v81_v49  ;;  %v65_v54 = vld [vmem:[%s1494_s1 + $0x60] sm:$0xff]  ;;  %v66_v55 = vld [vmem:[%s1494_s1 + $0x68] sm:$0xff]  ;;  %v84_v57 = vld [vmem:[%s1494_s1 + $0xf8] sm:$0xff] }
   0xe   :  { %1016 = vmatprep.subr.bf16.mxu0 %v1015_v26  ;;  %1041 = vmatprep.subr.bf16.mxu1 %v1107_v3  ;;  %v278_v58 = vld [vmem:[%s1496_s3] sm:$0xff]  ;;  %v279_v59 = vld [vmem:[%s1496_s3 + $0x8] sm:$0xff]  ;;  %v1029_v61 = vpack.c.bf16 %v66_v55, %v65_v54  ;;  %v46_v62 = vld [vmem:[%s1495_s0 + $0x10] sm:$0xff]  ;;  %v1031_v63 = vpack.c.bf16 %v84_v57, %v83_v56 }
   0xf   :  { %v93_v60 = vld [vmem:[%s1494_s1 + $0x140] sm:$0xf]  ;;  %v67_v0 = vld [vmem:[%s1494_s1 + $0x70] sm:$0xff]  ;;  %v68_v1 = vld [vmem:[%s1494_s1 + $0x78] sm:$0xff]  ;;  %v1048_v2 = vpack.c.bf16 %v279_v59, %v278_v58 }
  0x10   :  { %v280_v5 = vld [vmem:[%s1496_s3 + $0x10] sm:$0xff]  ;;  %v281_v6 = vld [vmem:[%s1496_s3 + $0x18] sm:$0xff]  ;;  %v1033_v7 = vpack.c.bf16 %v68_v1, %v67_v0  ;;  %v49_v8 = vld [vmem:[%s1495_s0 + $0x28] sm:$0xff] }
  0x11   :  { %1018 = vmatpush3.bf16.msra.mxu0 %v1017_v35  ;;  %1043 = vmatpush3.bf16.msra.mxu1 %v1042_v42  ;;  %v1051_v9 = vpack.c.bf16 %v281_v6, %v280_v5  ;;  %v44_v10 = vld [vmem:[%s1495_s0] sm:$0xff]  ;;  %v47_v13 = vld [vmem:[%s1495_s0 + $0x18] sm:$0xff]  ;;  %v50_v15 = vld [vmem:[%s1495_s0 + $0x30] sm:$0x3] }
  0x12   :  { %1020 = vmatprep.subr.bf16.mxu0 %v1019_v37  ;;  %1044 = vmatprep.subr.bf16.mxu1 %v1107_v3  ;;  %v52_v11 = vld [vmem:[%s1495_s0 + $0x40] sm:$0x3]  ;;  %v51_v14 = vld [vmem:[%s1495_s0 + $0x38] sm:$0x3]  ;;  %v283_v17 = vld [vmem:[%s1496_s3 + $0x28] sm:$0xff] }
  0x13   :  { %v48_v12 = vld [vmem:[%s1495_s0 + $0x20] sm:$0xff]  ;;  %v284_v19 = vld [vmem:[%s1496_s3 + $0x30] sm:$0xff]  ;;  %v285_v20 = vld [vmem:[%s1496_s3 + $0x38] sm:$0xff] }
  0x14   :  { %v282_v16 = vld [vmem:[%s1496_s3 + $0x20] sm:$0xff]  ;;  %v1057_v21 = vpack.c.bf16 %v285_v20, %v284_v19  ;;  %vm1067_vm9 = vmpackc.low %vm411_vm6, %vm1110_vm8 }
  0x15   :  { %1022 = vmatpush3.bf16.msra.mxu0 %v1021_v45  ;;  %1046 = vmatpush3.bf16.msra.mxu1 %v1045_v51  ;;  %v1054_v18 = vpack.c.bf16 %v283_v17, %v282_v16  ;;  %v286_v22 = vld [vmem:[%s1496_s3 + $0x40] sm:$0xff] }
  0x16   :  { %1024 = vmatprep.subr.bf16.mxu0 %v1023_v46  ;;  %907 = vmatprep.subr.mxu1 %v1109_v4  ;;  %v781_v30 = vld [vmem:[%s1497_s2] ss:$0 sm:$0xff] }
  0x17   :  { %v786_v48 = vld [vmem:[%s1498_s4] ss:$0 sm:$0xff]  ;;  %s1111_s4 = smov 8  }
  0x18   :  { %v406_v16 = vld [vmem:[%s1499_s5] sm:$0x3f] }
  0x19   :  { %1026 = vmatpush3.bf16.msra.mxu0 %v1025_v52  ;;  %908 = vmatpush3.msk.msra.mxu1 %vm111_vm1, %v93_v60  ;;  %v507_v20 = vld [vmem:[%s1500_s7] sm:$0xff] }
  0x1a   :  { %1028 = vmatprep.subr.bf16.mxu0 %v1027_v53  ;;  %910 = vmatmul.mubr.msk.f32.vlgmr.msra.gmra.mrb[0].mxu1 %vm101_vm2, %v46_v62 }
  0x1b   :  { %1047 = vmatprep.subr.bf16.mxu1 %v1107_v3  ;;  %912 = vmatprep.mubr.msk.f32.mxu1 %vm1108_vm0, %v1109_v4 }
  0x1c   :  { %1049 = vmatpush3.bf16.msra.mxu1 %v1048_v2 }
  0x1d   :  { %1030 = vmatpush3.bf16.msra.mxu0 %v1029_v61  ;;  %1050 = vmatprep.subr.bf16.mxu1 %v1107_v3 }
  0x1e   :  { %1032 = vmatprep.subr.bf16.mxu0 %v1031_v63  ;;  %913 = vmatmul.mubr.msk.f32.gmra.mrb[2].mxu1 %vm101_vm2, %v49_v8 }
  0x1f   :  { %915 = vmatprep.mubr.msk.f32.mxu1 %vm1108_vm0, %v1109_v4 }
  0x20   :  { %1052 = vmatpush3.bf16.msra.mxu1 %v1051_v9 }
  0x21   :  { %1034 = vmatpush3.bf16.msra.mxu0 %v1033_v7  ;;  %1053 = vmatprep.subr.bf16.mxu1 %v1107_v3 }
  0x22   :  { %1059 = vmatprep.subr.bf16.mxu0 %v1107_v3  ;;  %916 = vmatmul.mubr.msk.f32.gmra.mrb[4].mxu1 %vm101_vm2, %v52_v11 }
  0x23   :  { %936 = vmatprep.mubr.msk.f32.mxu1 %vm1108_vm0, %v1109_v4 }
  0x24   :  { %180 = vmatmul.mubr.f32.vlgmr.msra.gmra.mrb[0].mxu0 %v44_v10  ;;  %1055 = vmatpush3.bf16.msra.mxu1 %v1054_v18 }
  0x25   :  { %184 = vmatprep.mubr.f32.mxu0 %v48_v12  ;;  %1056 = vmatprep.subr.bf16.mxu1 %v1107_v3 }
  0x28   :  { %185 = vmatmul.mubr.f32.gmra.mrb[2].mxu0 %v47_v13  ;;  %1058 = vmatpush3.bf16.msra.mxu1 %v1057_v21  ;;  %v508_v21 = vld [vmem:[%s1500_s7 + $0x8] sm:$0xff] }
  0x29   :  { %189 = vmatprep.mubr.f32.mxu0 %v51_v14  ;;  %934 = vmatprep.subr.mxu1 %v1109_v4 }
  0x2c   :  { %190 = vmatmul.mubr.f32.gmra.mrb[4].mxu0 %v50_v15  ;;  %935 = vmatpush3.msra.mxu1 %v286_v22  ;;  %v1063_v22 = vpack.c.bf16 %v508_v21, %v507_v20 }
  0x2d   :  { %951 = vmatprep.mubr.msk.f32.mxu0 %vm1108_vm0, %v1109_v4  ;;  %1062 = vmatprep.subr.bf16.mxu1 %v1107_v3 }
  0xed   :  { %v261_v23 = vpop.f32.mrb[0].mxu1 }
  0xee   :  { %v911_v24 = vpop.f32.mrb[1].mxu1 }
  0xef   :  { %v510_v24 = vld [vmem:[%s1500_s7 + $0x18] sm:$0x3] }
  0xf1   :  { %v266_v25 = vpop.f32.mrb[2].mxu1 }
  0xf2   :  { %v914_v26 = vpop.f32.mrb[3].mxu1 }
  0xf5   :  { %v271_v28 = vpop.f32.mrb[4].mxu1 }
  0xf6   :  { %v917_v31 = vpop.f32.mrb[5].mxu1 }
  0xf7   :  { %v831_v27 = vpop.f32.mrb[0].mxu0  ;;  %v599_v31 = vld [vmem:[%s1502_s9 + $0x10] sm:$0xff] }
  0xf8   :  { %v832_v29 = vpop.f32.mrb[1].mxu0 }
  0xf9   :  { %v833_v32 = vadd.f32 %v832_v29, %v831_v27  ;;  %v597_v29 = vld [vmem:[%s1502_s9] sm:$0xff] }
  0xfb   :  { %v834_v33 = vpop.f32.mrb[2].mxu0  ;;  %v182_v34 = vadd.f32 %v833_v32, %v781_v30 }
  0xfc   :  { %v835_v35 = vpop.f32.mrb[3].mxu0 }
  0xfd   :  { %v262_v36 = vadd.f32 %v261_v23, %v182_v34  ;;  %v836_v37 = vadd.f32 %v835_v35, %v834_v33  ;;  %v509_v23 = vld [vmem:[%s1500_s7 + $0x10] sm:$0xff]  ;;  %v600_v35 = vld [vmem:[%s1502_s9 + $0x18] sm:$0xff] }
  0xff   :  { %v275_v38 = vmax.f32 %v262_v36, 0.0  ;;  %v837_v39 = vpop.f32.mrb[4].mxu0  ;;  %v187_v40 = vadd.f32 %v836_v37, %v781_v30  ;;  %v493_v36 = vld [vmem:[%s1501_s6] sm:$0x3]  ;;  %s1112_s6 = smov 16  }
 0x100   :  { %v838_v41 = vpop.f32.mrb[5].mxu0 }
 0x101   :  { %v267_v42 = vadd.f32 %v266_v25, %v187_v40  ;;  %v839_v43 = vadd.f32 %v838_v41, %v837_v39  ;;  %937 = vmatmul.mubr.msk.f32.vlgmr.msra.gmra.mrb[6].mxu1 %vm294_vm3, %v275_v38  ;;  %v1066_v25 = vpack.c.bf16 %v510_v24, %v509_v23  ;;  %v1073_v38 = vpack.c.bf16 %v600_v35, %v599_v31  ;;  %v601_v39 = vld [vmem:[%s1502_s9 + $0x20] sm:$0xff]  ;;  %v602_v40 = vld [vmem:[%s1502_s9 + $0x28] sm:$0xff] }
 0x102   :  { %939 = vmatprep.mubr.msk.f32.mxu1 %vm1108_vm0, %v1109_v4  ;;  %1064 = vmatpush3.bf16.msra.mxu1 %v1063_v22  ;;  %v500_v41 = vrot.slane %v493_v36, 6 }
 0x103   :  { %v276_v44 = vmax.f32 %v267_v42, 0.0  ;;  %v192_v45 = vadd.f32 %v839_v43, %v781_v30  ;;  %1065 = vmatprep.subr.bf16.mxu1 %v1107_v3  ;;  %v598_v30 = vld [vmem:[%s1502_s9 + $0x8] sm:$0xff]  ;;  %v1076_v42 = vpack.c.bf16 %v602_v40, %v601_v39 }
 0x104   :  { %v1070_v34 = vpack.c.bf16 %v598_v30, %v597_v29 }
 0x105   :  { %v272_v46 = vadd.f32 %v271_v28, %v192_v45  ;;  %940 = vmatmul.mubr.msk.f32.gmra.mrb[8].mxu1 %vm294_vm3, %v276_v44 }
 0x106   :  { %942 = vmatprep.mubr.msk.f32.mxu1 %vm1108_vm0, %v1109_v4  ;;  %1068 = vmatpush3.bf16.msk.msra.mxu1 %vm1067_vm9, %v1066_v25 }
 0x107   :  { %v277_v47 = vmax.f32 %v272_v46, 0.0  ;;  %1081 = vmatprep.subr.bf16.mxu1 %v1107_v3 }
 0x109   :  { %943 = vmatmul.mubr.msk.f32.gmra.mrb[10].mxu1 %vm294_vm3, %v277_v47 }
 0x10a   :  { %962 = vmatprep.mubr.msk.f32.mxu1 %vm1108_vm0, %v1109_v4 }
 0x1d4   :  { %v370_v49 = vpop.f32.mrb[6].mxu1 }
 0x1d5   :  { %v938_v50 = vpop.f32.mrb[7].mxu1  ;;  %v371_v51 = vadd.f32 %v786_v48, %v370_v49  ;;  %v604_v49 = vld [vmem:[%s1502_s9 + $0x38] sm:$0xff] }
 0x1d7   :  { %v385_v55 = vsel %vm384_vm4, %v371_v51, -inf }
 0x1d8   :  { %v375_v52 = vpop.f32.mrb[8].mxu1 }
 0x1d9   :  { %v376_v53 = vadd.f32 %v786_v48, %v375_v52  ;;  %v941_v54 = vpop.f32.mrb[9].mxu1  ;;  %v688_v52 = vld [vmem:[%s1503_s11 + $0x8] sm:$0xff] }
 0x1da   :  { %v690_v54 = vld [vmem:[%s1503_s11 + $0x18] sm:$0xff] }
 0x1db   :  { %v386_v56 = vsel %vm384_vm4, %v376_v53, -inf }
 0x1dc   :  { %v389_v57 = vmax.f32 %v385_v55, %v386_v56  ;;  %v380_v58 = vpop.f32.mrb[10].mxu1  ;;  %v691_v56 = vld [vmem:[%s1503_s11 + $0x20] sm:$0xff] }
 0x1dd   :  { %v381_v59 = vadd.f32 %v786_v48, %v380_v58  ;;  %v944_v60 = vpop.f32.mrb[11].mxu1  ;;  %v603_v48 = vld [vmem:[%s1502_s9 + $0x30] sm:$0xff] }
 0x1de   :  { %v1079_v50 = vpack.c.bf16 %v604_v49, %v603_v48 }
 0x1df   :  { %v388_v61 = vsel %vm387_vm5, %v381_v59, -inf }
 0x1e0   :  { %v390_v62 = vmax.f32 %v389_v57, %v388_v61  ;;  %v692_v57 = vld [vmem:[%s1503_s11 + $0x28] sm:$0xff] }
 0x1e1   :  { %v1088_v58 = vpack.c.bf16 %v692_v57, %v691_v56 }
 0x1e2   :  { %v391_v63 = vrot.slane %v390_v62, 4 }
 0x1e4   :  { %v392_v0 = vmax.f32 %v390_v62, %v391_v63 }
 0x1e6   :  { %v393_v1 = vrot.slane %v392_v0, 2 }
 0x1e8   :  { %v394_v2 = vmax.f32 %v392_v0, %v393_v1  ;;  %v693_v0 = vld [vmem:[%s1503_s11 + $0x30] sm:$0xff]  ;;  %v694_v1 = vld [vmem:[%s1503_s11 + $0x38] sm:$0xff] }
 0x1ea   :  { %v395_v5 = vrot.slane %v394_v2, 1 }
 0x1ec   :  { %v396_v6 = vmax.f32 %v394_v2, %v395_v5  ;;  %v1091_v2 = vpack.c.bf16 %v694_v1, %v693_v0 }
 0x1ee   :  { %v397_v7 = vsub.f32 %v371_v51, %v396_v6  ;;  %v398_v8 = vsub.f32 %v376_v53, %v396_v6  ;;  %v399_v9 = vsub.f32 %v381_v59, %v396_v6  ;;  %v687_v51 = vld [vmem:[%s1503_s11] sm:$0xff] }
 0x1ef   :  { %v1082_v53 = vpack.c.bf16 %v688_v52, %v687_v51  ;;  %v792_v59 = vld [vmem:[%s1504_s8] ss:$0 sm:$0xff] }
 0x1f0   :  { %v400_v10 = vmul.f32 1.442695, %v397_v7  ;;  %v402_v11 = vmul.f32 1.442695, %v398_v8  ;;  %v404_v12 = vmul.f32 1.442695, %v399_v9 }
 0x1f1   :  { %v797_v9 = vld [vmem:[%s1506_s12] ss:$0 sm:$0xff] }
 0x1f2   :  { %1099 = vpow2.f32 %v400_v10 }
 0x1f3   :  { %1101 = vpow2.f32 %v402_v11 }
 0x1f4   :  { %1103 = vpow2.f32 %v404_v12 }
 0x1fc   :  { %v1100_v13 = vpop.eup %1099 }
 0x1fd   :  { %v1102_v14 = vpop.eup %1101 }
 0x1fe   :  { %v1060_v15 = vpack.c.bf16 %v1102_v14, %v1100_v13  ;;  %v1104_v17 = vpop.eup %1103 }
 0x200   :  { %1061 = vmatpush3.bf16.msra.mxu0 %v1060_v15 }
 0x201   :  { %949 = vmatprep.subr.mxu0 %v1109_v4 }
 0x204   :  { %950 = vmatpush3.msk.msra.mxu0 %vm411_vm6, %v1104_v17 }
 0x205   :  { %952 = vmatmul.mubr.msk.f32.vlgmr.msra.gmra.mrb[6].mxu0 %vm407_vm7, %v406_v16  ;;  %1069 = vmatprep.subr.bf16.mxu0 %v1107_v3 }
 0x206   :  { %981 = vmatprep.mubr.msk.f32.mxu0 %vm1108_vm0, %v1109_v4  ;;  %1071 = vmatpush3.bf16.msra.mxu0 %v1070_v34 }
 0x207   :  { %1072 = vmatprep.subr.bf16.mxu0 %v1107_v3 }
 0x20a   :  { %1074 = vmatpush3.bf16.msra.mxu0 %v1073_v38 }
 0x20b   :  { %1075 = vmatprep.subr.bf16.mxu0 %v1107_v3 }
 0x20e   :  { %1077 = vmatpush3.bf16.msra.mxu0 %v1076_v42 }
 0x20f   :  { %1078 = vmatprep.subr.bf16.mxu0 %v1107_v3 }
 0x212   :  { %1080 = vmatpush3.bf16.msra.mxu0 %v1079_v50 }
 0x2d8   :  { %v481_v18 = vpop.f32.mrb[6].mxu0 }
 0x2d9   :  { %1105 = vrcp.f32 %v481_v18  ;;  %v953_v19 = vpop.f32.mrb[7].mxu0 }
 0x2e3   :  { %v1106_v26 = vpop.eup %1105 }
 0x2e4   :  { %v487_v27 = vrot.slane %v1106_v26, 6  ;;  %v490_v28 = vrot.slane %v1106_v26, 4 }
 0x2e6   :  { %v489_v32 = vmul.f32 %v487_v27, %v481_v18  ;;  %v492_v33 = vmul.f32 %v490_v28, %v481_v18 }
 0x2e8   :  { %v495_v37 = vrot.slane %v492_v33, 2 }
 0x2ea   :  { %496 = vrot.lane.b32.xlu0 %v495_v37, %s1111_s4 }
 0x2ee   :  { %501 = vrot.lane.b32.xlu0 %v500_v41, %s1112_s6 }
 0x35c   :  { %v497_v43 = vpop.permute.xlu0 %496 }
 0x35d   :  { %v504_v44 = vsel %vm384_vm4, %v489_v32, %v497_v43 }
 0x360   :  { %v502_v45 = vpop.permute.xlu0 %501 }
 0x361   :  { %v506_v46 = vsel %vm505_vm10, %v504_v44, %v502_v45 }
 0x362   :  { %v519_v47 = vrot.slane %v506_v46, 2 }
 0x364   :  { %963 = vmatmul.mubr.msk.f32.vlgmr.msra.gmra.mrb[12].mxu1 %vm520_vm11, %v519_v47 }
 0x365   :  { %1000 = vmatprep.mubr.msk.f32.mxu1 %vm1108_vm0, %v1109_v4  ;;  %v689_v4 = vld [vmem:[%s1503_s11 + $0x10] sm:$0xff]  ;;  %1083 = vmatpush3.bf16.msra.mxu1 %v1082_v53 }
 0x366   :  { %v1085_v55 = vpack.c.bf16 %v690_v54, %v689_v4  ;;  %1084 = vmatprep.subr.bf16.mxu1 %v1107_v3 }
 0x369   :  { %1086 = vmatpush3.bf16.msra.mxu1 %v1085_v55 }
 0x36a   :  { %1087 = vmatprep.subr.bf16.mxu1 %v1107_v3 }
 0x36d   :  { %1089 = vmatpush3.bf16.msra.mxu1 %v1088_v58 }
 0x36e   :  { %1090 = vmatprep.subr.bf16.mxu1 %v1107_v3  ;;  %v795_v3 = vld [vmem:[%s1505_s10] ss:$0 sm:$0xff] }
 0x371   :  { %1092 = vmatpush3.bf16.msra.mxu1 %v1091_v2 }
 0x437   :  { %v592_v60 = vpop.f32.mrb[12].mxu1 }
 0x438   :  { %v593_v61 = vadd.f32 %v792_v59, %v592_v60  ;;  %v964_v62 = vpop.f32.mrb[13].mxu1 }
 0x43a   :  { %v596_v63 = vmax.f32 %v593_v61, 0.0 }
 0x43c   :  { %982 = vmatmul.mubr.msk.f32.vlgmr.msra.gmra.mrb[8].mxu0 %vm612_vm12, %v596_v63 }
 0x50f   :  { %v682_v5 = vpop.f32.mrb[8].mxu0 }
 0x510   :  { %v683_v6 = vadd.f32 %v795_v3, %v682_v5  ;;  %v983_v7 = vpop.f32.mrb[9].mxu0 }
 0x512   :  { %v686_v8 = vmax.f32 %v683_v6, 0.0 }
 0x514   :  { %1001 = vmatmul.mubr.msk.f32.vlgmr.msra.gmra.mrb[14].mxu1 %vm612_vm12, %v686_v8 }
 0x5e7   :  { %v771_v10 = vpop.f32.mrb[14].mxu1 }
 0x5e8   :  { %v772_v11 = vadd.f32 %v797_v9, %v771_v10  ;;  %v1002_v12 = vpop.f32.mrb[15].mxu1 }
 0x5ea   :  { %776 = vst.msk [vmem:[%s1507_s13] sm:$0x3] %vm775_vm13, %v772_v11 }

</bundles_post_ra>
